<compile_context>
chip_gen: v5e
topology: v5e:2x2
jax: 0.10.0
libtpu: 0.0.40
codegen_flags: <defaults>
</compile_context>

<pallas_src>
import jax
import jax.numpy as jnp
from jax.experimental import pallas as pl
from jax.experimental.pallas import tpu as pltpu


def _shuffle_copy_kernel(x_ref, o_ref):
    # Input and output blocks contain the same elements in the same memory
    # order; only leading (pre-sublane/lane) dims differ, so this reshape is
    # metadata-only (no lane/sublane relayout).
    o_ref[...] = x_ref[...].reshape(o_ref.shape)


def _vmem_capacity_bytes():
    """Physical per-core VMEM bytes; conservative default if query fails."""
    try:
        return int(pltpu.get_tpu_info().vmem_capacity_bytes)
    except Exception:
        return 64 << 20  # v7x per-TensorCore physical VMEM (smallest of v5e/v6e/v7x)


def _pick_lane_width(hw):
    """Largest multiple-of-128 divisor of hw (capped at 2048); else hw itself."""
    lw = (min(hw, 2048) // 128) * 128
    while lw >= 128:
        if hw % lw == 0:
            return lw
        lw -= 128
    return hw


def _largest_divisor_leq(n, cap, step=1):
    """Largest divisor of n that is <= cap and a multiple of `step` (or None)."""
    best = None
    d = step
    cap = min(cap, n)
    while d <= cap:
        if n % d == 0:
            best = d
        d += step
    return best


def channel_shuffle(x, groups: int):
    """Pallas ChannelShuffle.  x: (B, C, H, W), C % groups == 0."""
    B, C, H, W = x.shape
    assert C % groups == 0, "channels must be divisible by groups"
    g = groups
    cpg = C // g
    itemsize = x.dtype.itemsize
    hw = H * W

    lw = _pick_lane_width(hw)
    rows = hw // lw                      # rows * lw == hw (lw divides hw)
    plane_bytes = hw * itemsize          # one channel's spatial plane

    # --- Generation-aware block-size / VMEM budget -------------------------
    vmem_cap = _vmem_capacity_bytes()
    target_block = min(8 << 20, vmem_cap // 16)        # ~4 MiB v7x, ~8 MiB v5e/v6e
    vmem_limit = min((3 * vmem_cap) // 4,               # never above ~3/4 physical
                     4 * target_block + (16 << 20))     # double-buffered in+out + slack

    sub = max(8, 32 // max(1, itemsize))  # sublane unit: 8 f32 / 16 bf16 / 32 i8

    # Iterate one-at-a-time over the smaller channel factor, batch the larger.
    small_is_g = g <= cpg
    small = g if small_is_g else cpg
    big = cpg if small_is_g else g

    if plane_bytes >= target_block:
        # Huge spatial plane: one channel plane per step, tile the rows.
        big_t = 1
        n_big = big
        max_rows = max(1, target_block // (lw * itemsize))
        s_tile = _largest_divisor_leq(rows, max_rows, step=sub)
        if s_tile is None:
            # No aligned divisor: aligned tile + ragged (masked) last block.
            s_tile = min(rows, max(sub, (max_rows // sub) * sub))
        n_t = pl.cdiv(rows, s_tile)
    else:
        # Common case: whole spatial plane per channel; batch `big` channels
        # per block until the ~target_block byte budget is reached.
        s_tile = rows
        n_t = 1
        max_big = max(1, target_block // plane_bytes)
        big_t = _largest_divisor_leq(big, max_big, step=1) or 1
        n_big = big // big_t

    x5 = x.reshape(B, g, cpg, rows, lw)  # free reshape (contiguous NCHW)
    out_shape = jax.ShapeDtypeStruct((B, cpg, g, rows, lw), x.dtype)

    if small_is_g:
        # Grid over j (the g axis); batch a big_t tile of the cpg axis.
        # Both blocks are big_t contiguous (s_tile, lw) planes -> pure copy.
        in_block = (1, 1, big_t, s_tile, lw)
        out_block = (1, big_t, 1, s_tile, lw)
        in_map = lambda b, j, ib, t: (b, j, ib, t, 0)
        out_map = lambda b, j, ib, t: (b, ib, j, t, 0)
    else:
        # Grid over i (the cpg axis); batch a big_t tile of the g axis.
        in_block = (1, big_t, 1, s_tile, lw)
        out_block = (1, 1, big_t, s_tile, lw)
        in_map = lambda b, i, jb, t: (b, jb, i, t, 0)
        out_map = lambda b, i, jb, t: (b, i, jb, t, 0)

    cost = pl.CostEstimate(
        flops=0,
        transcendentals=0,
        bytes_accessed=2 * B * C * hw * itemsize,
    )

    out5 = pl.pallas_call(
        _shuffle_copy_kernel,
        out_shape=out_shape,
        grid=(B, small, n_big, n_t),
        in_specs=[pl.BlockSpec(in_block, in_map)],
        out_specs=pl.BlockSpec(out_block, out_map),
        compiler_params=pltpu.CompilerParams(
            # Informational: all grid axes are independent (pure permutation).
            dimension_semantics=("parallel", "parallel", "parallel", "parallel"),
            vmem_limit_bytes=vmem_limit,
        ),
        cost_estimate=cost,
    )(x5)

    return out5.reshape(B, C, H, W)


def channel_shuffle_ref(x, groups: int):
    """Pure-JAX reference matching the PyTorch semantics exactly."""
    B, C, H, W = x.shape
    cpg = C // groups
    y = x.reshape(B, groups, cpg, H, W)
    y = jnp.transpose(y, (0, 2, 1, 3, 4))
    return y.reshape(B, C, H, W)


if __name__ == "__main__":
    key = jax.random.PRNGKey(0)

    # Main test: shapes implied by the module (lane-dense path, g <= cpg).
    B, C, H, W = 2, 4, 16, 16
    groups = 2
    x = jax.random.normal(key, (B, C, H, W), dtype=jnp.float32)
    out = jax.block_until_ready(channel_shuffle(x, groups))
    ref = channel_shuffle_ref(x, groups)
    assert out.shape == (B, C, H, W)
    assert out.dtype == x.dtype
    assert jnp.array_equal(out, ref), "Pallas ChannelShuffle mismatch (main)"

    # Secondary check: odd spatial size (H*W not a multiple of 128) and g > cpg.
    x2 = jax.random.normal(jax.random.PRNGKey(1), (2, 6, 7, 5), dtype=jnp.float32)
    out2 = jax.block_until_ready(channel_shuffle(x2, 3))
    ref2 = channel_shuffle_ref(x2, 3)
    assert jnp.array_equal(out2, ref2), "Pallas ChannelShuffle mismatch (odd spatial)"

    # Third check: g > cpg with lane-dense spatial (exercises direction A batching).
    x3 = jax.random.normal(jax.random.PRNGKey(2), (1, 12, 8, 16), dtype=jnp.float32)
    out3 = jax.block_until_ready(channel_shuffle(x3, 4))
    ref3 = channel_shuffle_ref(x3, 4)
    assert jnp.array_equal(out3, ref3), "Pallas ChannelShuffle mismatch (g > cpg)"

    print("KERNEL_OK")
</pallas_src>

<mosaic_0001>
module attributes {stable_mosaic.version = 11 : i64} {
  func.func @_shuffle_copy_kernel(%arg0: i32, %arg1: i32, %arg2: i32, %arg3: i32, %arg4: memref<1x1x2x1x256xf32, #tpu.memory_space<vmem>>, %arg5: memref<1x2x1x1x256xf32, #tpu.memory_space<vmem>>) attributes {dimension_semantics = [#tpu.dimension_semantics<parallel>, #tpu.dimension_semantics<parallel>, #tpu.dimension_semantics<parallel>, #tpu.dimension_semantics<parallel>], iteration_bounds = array<i64: 2, 2, 1, 1>, scalar_prefetch = 0 : i64, scratch_operands = 0 : i64, tpu.core_type = #tpu.core_type<tc>, window_params = [{transform_indices = @transform_0, window_bounds = array<i64: 1, 1, 2, 1, 256>}, {transform_indices = @transform_1, window_bounds = array<i64: 1, 2, 1, 1, 256>}]} {
    %c0 = arith.constant 0 : index
    %c0_0 = arith.constant 0 : index
    %c0_1 = arith.constant 0 : index
    %c0_2 = arith.constant 0 : index
    %c0_3 = arith.constant 0 : index
    %0 = vector.load %arg4[%c0, %c0_0, %c0_1, %c0_2, %c0_3] : memref<1x1x2x1x256xf32, #tpu.memory_space<vmem>>, vector<1x1x2x1x256xf32>
    %1 = vector.shape_cast %0 : vector<1x1x2x1x256xf32> to vector<1x2x1x1x256xf32>
    %c0_4 = arith.constant 0 : index
    %c0_5 = arith.constant 0 : index
    %c0_6 = arith.constant 0 : index
    %c0_7 = arith.constant 0 : index
    %c0_8 = arith.constant 0 : index
    %2 = vector.load %arg5[%c0_4, %c0_5, %c0_6, %c0_7, %c0_8] : memref<1x2x1x1x256xf32, #tpu.memory_space<vmem>>, vector<1x2x1x1x256xf32>
    tpu.vector_store %arg5[%c0_4, %c0_5, %c0_6, %c0_7, %c0_8], %1 {strides = array<i32>} : memref<1x2x1x1x256xf32, #tpu.memory_space<vmem>>, vector<1x2x1x1x256xf32>,
    return
  }
  func.func @transform_0(%arg0: i32, %arg1: i32, %arg2: i32, %arg3: i32) -> (i32, i32, i32, i32, i32) {
    %c0_i32 = arith.constant 0 : i32
    %c0_i32_0 = arith.constant 0 : i32
    return %arg0, %arg1, %arg2, %arg3, %c0_i32 : i32, i32, i32, i32, i32
  }
  func.func @transform_1(%arg0: i32, %arg1: i32, %arg2: i32, %arg3: i32) -> (i32, i32, i32, i32, i32) {
    %c0_i32 = arith.constant 0 : i32
    %c0_i32_0 = arith.constant 0 : i32
    return %arg0, %arg2, %arg1, %arg3, %c0_i32 : i32, i32, i32, i32, i32
  }
}

</mosaic_0001>

<bundles_post_ra>
// kernel: tpu_custom_call.1
= control target key start
LH: loop header
LB: loop body
LE: loop exit
PB: predicated region body
PF: predicated region fallthrough
CT: control target
= control target key end

     0   :  { %6 = vsyncpa [#allocation3], 0  ;;  %s700_s0 = inlined_call_operand.hbm [shape: f32[2,2,2,1,256], index: 0, kind: input, shape index: {}]   ;;  %s701_s1 = inlined_call_operand.hbm [shape: f32[2,2,2,1,256], index: 1, kind: output, shape index: {}]  }
   0x1   :  { %8 = vsyncpa [#allocation3 + $0x1], 0 }
   0x2   :  { %9 = vsyncpa [#allocation4], 0 }
   0x3   :  { %11 = vsyncpa [#allocation4 + $0x1], 0  ;;  %s558_s6 = smov 0   ;;  %s560_s7 = smov 0  }
   0x4   :  { %s562_s8 = smov 0   ;;  %s564_s9 = smov 0  }
   0x5   :  { %s566_s10 = smov 0   ;;  %s568_s11 = smov 0  }
   0x6   :  { %s570_s12 = smov 0   ;;  %s572_s13 = smov 0  }
   0x7 LB: > { %s315_s14 = sadd.s32 4294967295, %s541_s13   ;;  %s316_s15 = sadd.s32 4294967294, %s541_s13   ;;  %s541_s13 = sphi %s572_s13, %s17_s13   ;;  %s537_s12 = sphi %s570_s12, %s712_s12   ;;  %s533_s11 = sphi %s568_s11, %s711_s11   ;;  %s529_s10 = sphi %s566_s10, %s710_s10   ;;  %s525_s9 = sphi %s564_s9, %s709_s9   ;;  %s521_s8 = sphi %s562_s8, %s708_s8   ;;  %s517_s7 = sphi %s560_s7, %s707_s7   ;;  %s513_s6 = sphi %s558_s6, %s706_s6  }
   0x8   : > { %s39_s16 = sadd.s32 1, %s533_s11  ;;  %s43_s17 = sadd.s32 1, %s537_s12 }
   0x9   : > { %p41_p0 = scmp.ge.s32.totalorder %s39_s16, 2  ;;  %s56_s18 = sadd.s32 1, %s521_s8 }
   0xa   : > { %p63_p1 = scmp.ne.s32.totalorder %s521_s8, %s517_s7  ;;  %p64_p2 = scmp.eq.s32.totalorder %s541_s13, 0 }
   0xb   : > { %s714_s16 = smov (%p41_p0, %s39_s16), 0  ;;  %s716_s17 = smov (!%p41_p0, %s43_s17), %s537_s12 }
   0xc   : > { %s48_s19 = ssub.s32 %s533_s11, %s714_s16  ;;  %p611_p3 = por %p64_p2, %p63_p1 }
   0xd   : > { %p45_p4 = scmp.ge.s32.totalorder %s716_s17, 2  ;;  %p69_p5 = scmp.ne.s32.totalorder %s517_s7, %s513_s6 }
   0xe   : > { %p70_p6 = scmp.eq.s32.totalorder %s315_s14, 0  ;;  %p99_p7 = scmp.eq.s32.totalorder %s315_s14, 3 }
   0xf   : > { %s718_s17 = smov (%p45_p4, %s716_s17), 0  ;;  %p105_p10 = scmp.eq.s32.totalorder %s316_s15, 3 }
  0x10   : > { %p619_p8 = por %p70_p6, %p69_p5  ;;  %p623_p9 = por %p99_p7, %p63_p1 }
  0x11   : > { %s47_s23 = ssub.s32 %s537_s12, %s718_s17  ;;  %p629_p12 = por %p105_p10, %p69_p5 }
  0x12   : > { %s49_s24 = sor.u32 %s48_s19, %s47_s23  ;;  %p342_p13 = scmp.lt.s32.totalorder %s541_s13, 4 }
  0x13   : > { %p54_p11 = scmp.eq.s32.totalorder %s49_s24, 0  ;;  %s125_s26 = sand.u32 1, %s521_s8  }
  0x14   : > { %s319_s28 = sshll.u32 %s125_s26, 2  ;;  %s320_s29 = sshll.u32 %s533_s11, 2 }
  0x15   : > { %s636_s27 = scalar_select %p54_p11, %s521_s8, %s56_s18  }
  0x16   : > { %s321_s30 = sshll.u32 %s537_s12, 3  ;;  %s129_s2 = scalar_lea.vmem [#allocation2], %s319_s28 }
  0x17   : > { %s143_s3 = sshll.u32 %s129_s2, 4  ;;  %s139_s4 = sadd.s32 %s321_s30, %s320_s29  ;;  %s144_s3 = int_to_ptr.vmem [resolvable:$true] %s143_s3 }
  0x18   : > { %s140_s15 = scalar_lea.hbm %s700_s0, %s139_s4  ;;  %p335_p0 = pnand %p342_p13, %p611_p3 }
  0x19   : > { %s141_s19 = sshll.u32 %s140_s15, 4  ;;  %p322_p1 = scmp.ge.s32.totalorder %s541_s13, 1  ;;  %s142_s19 = int_to_ptr.hbm [resolvable:$true] %s141_s19 }
  0x1a   : > { %s126_s23 = scalar_lea.sflag [#allocation3], %s125_s26  ;;  %s543_s18 = smov 32  }
  0x1b   : > { %s544_s24 = smov 2   ;;  %p151_p2 = scmp.lt.s32.totalorder %s541_s13, 5 }
  0x1c   : > { %337 = dma.hbm_to_vmem [thread:$0]  (!%p335_p0), %s142_s19, 64, %s144_s3, %s126_s23, %s543_s18, %s543_s18, %s544_s24  }
  0x1d   : > { %p152_p4 = pnand %p322_p1, %p151_p2 }
  0x1e   : > { %s648_s28 = sand.u32 (!%p152_p4), 1, %s517_s7  }
  0x1f   : > { %155 = sbr.rel (%p152_p4) target bundleno = 56 (0x38), region = 24  ;;  %s323_s29 = sshll.u32 (!%p152_p4), %s648_s28, 2 }
  0x20   : > { %s158_s30 = scalar_lea.sflag (!%p152_p4), [#allocation3], %s648_s28  ;;  %s161_s20 = scalar_lea.vmem (!%p152_p4), [#allocation2], %s323_s29 }
  0x24   : > { %504 = dma.done.wait (%p619_p8), %s158_s30, 64  }
  0x25   : > { %506 = vsyncadd (%p619_p8), %s158_s30, 4294967232  ;;  %v185_v0 = vlaneseq  ;;  %s326_s26 = sshll.u32 %s525_s9, 1  ;;  %s180_s2 = scalar_lea.vmem [#allocation5], %s323_s29  ;;  %v183_v1 = vld [vmem:[%s161_s20] sm:$0x3] }
  0x26   : > { %s210_s3 = sshll.u32 %s180_s2, 4  ;;  %s327_s4 = sshll.u32 %s529_s10, 3  ;;  %v184_v2 = vld [vmem:[%s161_s20 + $0x2] sm:$0x3]  ;;  %s211_s3 = int_to_ptr.vmem [resolvable:$true] %s210_s3 }
  0x27   : > { %s208_s5 = sadd.s32 %s327_s4, %s326_s26  ;;  %vm187_vm0 = vcmp.lt.s32.totalorder %v185_v0, 256  ;;  %s192_s21 = scalar_lea.sflag [#allocation4], %s648_s28 }
  0x28   : > { %s209_s19 = scalar_lea.hbm %s701_s1, %s208_s5  ;;  %189 = vst.msk [vmem:[%s180_s2] sm:$0x3] %vm187_vm0, %v183_v1  ;;  %s463_s29 = scalar_lea.hbm %s701_s1, 16 }
  0x29   : > { %s212_s23 = sshll.u32 %s209_s19, 4  ;;  %190 = vst.msk [vmem:[%s180_s2 + $0x2] sm:$0x3] %vm187_vm0, %v184_v2  ;;  %s213_s23 = int_to_ptr.hbm [resolvable:$true] %s212_s23 }
  0x2a   : > { %s457_s18 = sshra.s32 %s213_s23, 4  ;;  %s458_s18 = int_to_ptr.hbm [resolvable:$true] %s457_s18 }
  0x2b   : > { %s459_s9 = scalar_lea.hbm %s458_s18, 4  ;;  %p464_p7 = scmp.lt.s32.totalorder %s458_s18, %s701_s1 }
  0x2c   : > { %p460_p3 = scmp.ne.s32.totalorder %s458_s18, %s459_s9  ;;  %p465_p8 = scmp.lt.s32.totalorder %s463_s29, %s459_s9 }
  0x2e   : > { %p461_p5 = pnand %p460_p3, %p623_p9  ;;  %p466_p10 = por %p465_p8, %p464_p7 }
  0x30   : > { %p462_p6 = pneg %p461_p5 }
  0x32   : > { %p467_p11 = pnand %p466_p10, %p462_p6 }
  0x34   : > { %470 = shalt.err (!%p467_p11)
}
  0x35   : > { %s545_s28 = smov 32   ;;  %s546_s20 = smov 64  }
  0x36   : > { %s547_s2 = smov 2  }
  0x37   : > { %332 = dma.vmem_to_hbm [thread:$0]  (%p623_p9), %s211_s3, 64, %s213_s23, %s192_s21, %s545_s28, %s546_s20, %s547_s2  }
  0x38 PF: > { %p343_p13 = scmp.ge.s32.totalorder %s541_s13, 2  ;;  %s227_s4 = sand.u32 1, %s513_s6  }
  0x39   : > { %s228_s5 = scalar_lea.sflag [#allocation4], %s227_s4 }
  0x3a   : > { %p339_p0 = pnand %p343_p13, %p629_p12 }
  0x3c   : > { %p340_p1 = pneg %p339_p0 }
  0x3e   : > { %508 = dma.done.wait (%p340_p1), %s228_s5, 64  }
  0x3f   : > { %510 = vsyncadd (%p340_p1), %s228_s5, 4294967232  ;;  %s17_s13 = sadd.s32 1, %s541_s13   ;;  %s706_s6 = smov %s517_s7 }
  0x40   : > { %p14_p2 = scmp.ge.s32.totalorder %s17_s13, 6   ;;  %s707_s7 = smov %s521_s8 }
  0x41   : > { %s708_s8 = smov %s636_s27  ;;  %s709_s9 = smov %s533_s11 }
  0x42   : > { %s710_s10 = smov %s537_s12  ;;  %s711_s11 = smov %s714_s16 }
  0x43   : > { %s712_s12 = smov %s718_s17  ;;  %16 = sbr.rel (!%p14_p2) target bundleno = 7 (0x7), region = 69 }
  0x48   :  { %234 = vsyncpa [#allocation3], 1 }
  0x49   :  { %236 = vsyncpa [#allocation3 + $0x1], 1 }
  0x4a   :  { %237 = vsyncpa [#allocation4], 1 }
  0x4b   :  { %239 = vsyncpa [#allocation4 + $0x1], 1 }

</bundles_post_ra>
